<compile_context>
chip_gen: v5e
topology: v5e:2x2
jax: 0.10.0
libtpu: 0.0.40
codegen_flags: <defaults>
</compile_context>

<pallas_src>
from typing import NamedTuple

import jax
import jax.numpy as jnp
from jax.experimental import pallas as pl
from jax.experimental.pallas import tpu as pltpu


def _round_up(x, m):
    return ((x + m - 1) // m) * m


def _vmem_capacity_bytes():
    """Physical per-core VMEM; conservative fallback if the query is unavailable."""
    try:
        return int(pltpu.get_tpu_info().vmem_capacity_bytes)
    except Exception:
        return 64 << 20  # v7x per-TC size: safe lower bound across generations


class PackedMLPWeights(NamedTuple):
    """Pre-packed SwiGLU weights (build once, reuse every forward call)."""
    wgu: jax.Array  # [n_i, H, 2*ti]  per-I-tile contiguous [gate_tile | up_tile]
    wd: jax.Array   # [I_pad, H]      down_proj weight (padded rows are zero)


def pack_llama_mlp_weights(w_gate, w_up, w_down, *, ti=None,
                           compute_dtype=jnp.bfloat16):
    """One-time packing: cast to compute dtype, pick ti, lay out contiguous I tiles.

    w_gate, w_up : [H, I]   (transposed vs. torch nn.Linear)
    w_down       : [I, H]
    """
    H, I = w_gate.shape
    compute_dtype = jnp.dtype(compute_dtype)

    if ti is None:
        # Smaller I tiles on 64-MiB-VMEM parts (v7x) so a large tm still fits.
        ti = 256 if _vmem_capacity_bytes() < (100 << 20) else 512

    if I <= ti:
        ti = I                                   # single reduction step
    else:
        ti = max(128, (ti // 128) * 128)
        # Prefer a ti >= 256 that divides I exactly (avoids padded MXU/DMA work).
        for cand in range(ti, 255, -128):
            if I % cand == 0:
                ti = cand
                break

    I_pad = _round_up(I, ti)
    n_i = I_pad // ti

    wg = w_gate.astype(compute_dtype)
    wu = w_up.astype(compute_dtype)
    wd = w_down.astype(compute_dtype)
    if I_pad != I:                               # padding is numerically inert
        pad = I_pad - I
        wg = jnp.pad(wg, ((0, 0), (0, pad)))
        wu = jnp.pad(wu, ((0, 0), (0, pad)))
        wd = jnp.pad(wd, ((0, pad), (0, 0)))

    # [n_i, H, 2*ti]: each I tile is one contiguous HBM slab [gate_tile | up_tile],
    # so the per-step weight DMA is a single dense copy instead of H strided rows.
    wgu = jnp.concatenate(
        [wg.reshape(H, n_i, ti).transpose(1, 0, 2),
         wu.reshape(H, n_i, ti).transpose(1, 0, 2)], axis=2)
    return PackedMLPWeights(wgu=wgu, wd=wd)


def _mlp_kernel(x_ref, wgu_ref, wd_ref, o_ref, acc_ref):
    # x_ref   : [tm, H]       token tile (compute dtype)
    # wgu_ref : [H, 2*ti]     packed [gate_tile | up_tile] weights (one I tile)
    # wd_ref  : [ti, H]       down_proj weight tile
    # o_ref   : [tm, H]       output tile (written only on the last I step)
    # acc_ref : [tm, H] f32   down_proj accumulator across the I (reduction) axis
    i = pl.program_id(1)
    ti = wd_ref.shape[0]
    cdt = wd_ref.dtype

    # Single fused MXU matmul for the gate+up projections of this I tile.
    gu = jnp.dot(x_ref[...], wgu_ref[...], preferred_element_type=jnp.float32)

    # SiLU(gate) * up in the compute dtype: in the bf16 path the value feeds a
    # bf16 matmul next anyway, and bf16 elementwise halves VPU/EUP work and vreg
    # pressure for the [tm, ti] intermediate (v6e/v7x have bf16 VPU/EUP).
    gate = gu[:, :ti].astype(cdt)
    up = gu[:, ti:].astype(cdt)
    hidden = (gate * jax.nn.sigmoid(gate)) * up
    partial = jnp.dot(hidden, wd_ref[...], preferred_element_type=jnp.float32)

    is_first = i == 0
    is_last = i == pl.num_programs(1) - 1

    # No zero-init + read-modify-write on step 0, and the last step writes o_ref
    # directly from acc + partial (saves two full [tm, H] f32 VMEM passes).
    @pl.when(jnp.logical_and(is_first, is_last))
    def _():
        o_ref[...] = partial.astype(o_ref.dtype)

    @pl.when(jnp.logical_and(is_first, jnp.logical_not(is_last)))
    def _():
        acc_ref[...] = partial

    @pl.when(jnp.logical_and(jnp.logical_not(is_first), jnp.logical_not(is_last)))
    def _():
        acc_ref[...] += partial

    @pl.when(jnp.logical_and(jnp.logical_not(is_first), is_last))
    def _():
        o_ref[...] = (acc_ref[...] + partial).astype(o_ref.dtype)


def llama_mlp_packed(x, packed, *, tm=None):
    """SwiGLU MLP forward with pre-packed weights.

    x      : [..., H]  (output keeps x's dtype; bf16 path rounds the SwiGLU
                        intermediate to bf16 before down_proj — intended)
    packed : PackedMLPWeights from pack_llama_mlp_weights
    """
    *lead, H = x.shape
    n_i, Hw, two_ti = packed.wgu.shape
    assert Hw == H, "hidden size mismatch between x and packed weights"
    ti = two_ti // 2
    out_dtype = x.dtype
    cdt = packed.wgu.dtype

    M = 1
    for d in lead:
        M *= d
    x2d = x.reshape(M, H).astype(cdt)

    cbytes = jnp.dtype(cdt).itemsize
    obytes = jnp.dtype(out_dtype).itemsize
    sublane = 16 if cbytes == 2 else 8

    # ---- VMEM budget: physical capacity minus compiler headroom -------------
    vmem_cap = _vmem_capacity_bytes()
    budget = max(vmem_cap - (6 << 20), 16 << 20)

    # ---- token tile selection ------------------------------------------------
    if tm is None:
        # flops per weight byte == tm; keep it above each generation's HBM
        # roofline (~240 v5e, ~650 v6e, ~310/TC v7x) when M is large enough.
        tm = 1024 if vmem_cap >= (100 << 20) else 512
    tm = max(sublane, min(tm, _round_up(M, sublane)))   # decode: tm follows M
    tm = _round_up(tm, sublane)

    def _need(tm_):
        return (2 * tm_ * H * cbytes          # x tiles (double-buffered)
                + 2 * H * two_ti * cbytes     # packed [gate|up] tiles
                + 2 * ti * H * cbytes         # down_proj tiles
                + 2 * tm_ * H * obytes        # output tiles
                + tm_ * H * 4)                # f32 accumulator

    while _need(tm) > budget and tm > sublane:
        new_tm = max(sublane, _round_up(tm // 2, sublane))
        if new_tm == tm:
            break
        tm = new_tm
    # TODO(synk): if the weight tiles alone exceed the budget (very large H),
    # additionally tile the hidden (K) dim of the gate/up matmul.

    M_pad = _round_up(M, tm)
    if M_pad != M:
        x2d = jnp.pad(x2d, ((0, M_pad - M), (0, 0)))    # zero rows: inert
    n_m = M_pad // tm

    vmem_limit = int(min(budget, max(_need(tm) + (2 << 20), 16 << 20)))

    out = pl.pallas_call(
        _mlp_kernel,
        out_shape=jax.ShapeDtypeStruct((M_pad, H), out_dtype),
        grid_spec=pltpu.PrefetchScalarGridSpec(
            num_scalar_prefetch=0,
            grid=(n_m, n_i),                                   # reduction axis last
            in_specs=[
                pl.BlockSpec((tm, H), lambda m, i: (m, 0)),           # x tile
                pl.BlockSpec((None, H, two_ti), lambda m, i: (i, 0, 0)),  # [gate|up]
                pl.BlockSpec((ti, H), lambda m, i: (i, 0)),           # down tile
            ],
            out_specs=pl.BlockSpec((tm, H), lambda m, i: (m, 0)),
            scratch_shapes=[pltpu.VMEM((tm, H), jnp.float32)],
        ),
        compiler_params=pltpu.CompilerParams(
            dimension_semantics=("parallel", "arbitrary"),
            vmem_limit_bytes=vmem_limit),
    )(x2d, packed.wgu, packed.wd)

    if M_pad != M:
        out = out[:M]
    return out.reshape(*lead, H)


def llama_mlp(x, w_gate, w_up, w_down, *, tm=None, ti=None,
              compute_dtype=jnp.bfloat16):
    """Convenience wrapper (packs per call). For production, call
    pack_llama_mlp_weights once and reuse llama_mlp_packed."""
    packed = pack_llama_mlp_weights(w_gate, w_up, w_down, ti=ti,
                                    compute_dtype=compute_dtype)
    return llama_mlp_packed(x, packed, tm=tm)


def llama_mlp_ref(x, w_gate, w_up, w_down):
    g = x @ w_gate
    u = x @ w_up
    return (jax.nn.silu(g) * u) @ w_down


if __name__ == "__main__":
    hidden_size = 32
    intermediate_size = 64
    batch, seq = 2, 8

    key = jax.random.PRNGKey(0)
    kx, kg, ku, kd = jax.random.split(key, 4)

    x = jax.random.normal(kx, (batch, seq, hidden_size), dtype=jnp.float32)
    # Deterministic synthetic params, stored as [in, out].
    w_gate = jax.random.normal(kg, (hidden_size, intermediate_size),
                               dtype=jnp.float32) * 0.05
    w_up = jax.random.normal(ku, (hidden_size, intermediate_size),
                             dtype=jnp.float32) * 0.05
    w_down = jax.random.normal(kd, (intermediate_size, hidden_size),
                               dtype=jnp.float32) * 0.05

    # f32 compute path: tight check against the f32 reference.
    packed_f32 = pack_llama_mlp_weights(w_gate, w_up, w_down,
                                        compute_dtype=jnp.float32)
    out_f32 = jax.block_until_ready(llama_mlp_packed(x, packed_f32))
    ref_f32 = llama_mlp_ref(x, w_gate, w_up, w_down)
    assert out_f32.shape == (batch, seq, hidden_size)
    assert jnp.allclose(out_f32, ref_f32, atol=1e-5, rtol=1e-5), "f32 mismatch"

    # bf16 compute path (production default): loose check against a reference
    # built from the same bf16-cast operands (f32 accumulation). The SwiGLU
    # intermediate is intentionally rounded to bf16 before down_proj.
    packed_bf16 = pack_llama_mlp_weights(w_gate, w_up, w_down,
                                         compute_dtype=jnp.bfloat16)
    out_bf16 = jax.block_until_ready(llama_mlp_packed(x, packed_bf16))
    ref_bf16 = llama_mlp_ref(
        x.astype(jnp.bfloat16).astype(jnp.float32),
        w_gate.astype(jnp.bfloat16).astype(jnp.float32),
        w_up.astype(jnp.bfloat16).astype(jnp.float32),
        w_down.astype(jnp.bfloat16).astype(jnp.float32))
    assert jnp.allclose(out_bf16, ref_bf16, atol=5e-2, rtol=5e-2), "bf16 mismatch"

    # Per-call convenience wrapper smoke test (same bf16 default path).
    out_conv = jax.block_until_ready(llama_mlp(x, w_gate, w_up, w_down))
    assert jnp.allclose(out_conv, ref_bf16, atol=5e-2, rtol=5e-2), "wrapper mismatch"

    print("KERNEL_OK")
</pallas_src>

<mosaic_0001>
module attributes {stable_mosaic.version = 11 : i64} {
  func.func @_mlp_kernel(%arg0: i32, %arg1: i32, %arg2: memref<16x32xf32, #tpu.memory_space<vmem>>, %arg3: memref<1x32x128xf32, #tpu.memory_space<vmem>>, %arg4: memref<64x32xf32, #tpu.memory_space<vmem>>, %arg5: memref<16x32xf32, #tpu.memory_space<vmem>>, %arg6: memref<16x32xf32, #tpu.memory_space<vmem>>) attributes {dimension_semantics = [#tpu.dimension_semantics<parallel>, #tpu.dimension_semantics<arbitrary>], iteration_bounds = array<i64: 1, 1>, scalar_prefetch = 0 : i64, scratch_operands = 1 : i64, tpu.core_type = #tpu.core_type<tc>, window_params = [{transform_indices = @transform_0, window_bounds = array<i64: 16, 32>}, {transform_indices = @transform_1, window_bounds = array<i64: 1, 32, 128>}, {transform_indices = @transform_2, window_bounds = array<i64: 64, 32>}, {transform_indices = @transform_3, window_bounds = array<i64: 16, 32>}]} {
    %c0 = arith.constant 0 : index
    %c0_0 = arith.constant 0 : index
    %0 = vector.load %arg2[%c0, %c0_0] : memref<16x32xf32, #tpu.memory_space<vmem>>, vector<16x32xf32>
    %c0_1 = arith.constant 0 : index
    %c0_2 = arith.constant 0 : index
    %c0_3 = arith.constant 0 : index
    %1 = vector.load %arg3[%c0_1, %c0_2, %c0_3] : memref<1x32x128xf32, #tpu.memory_space<vmem>>, vector<1x32x128xf32>
    %2 = vector.shape_cast %1 : vector<1x32x128xf32> to vector<32x128xf32>
    %cst = arith.constant dense<0.000000e+00> : vector<16x128xf32>
    %3 = tpu.matmul %0, %2, %cst {dimension_numbers = #tpu.dot_dimension_numbers<[1], [0], [0], [1], [0, 0, 1, 1], [], []>} : vector<16x32xf32>, vector<32x128xf32>, vector<16x128xf32> -> vector<16x128xf32>
    %4 = vector.extract_strided_slice %3 {offsets = [0, 0], sizes = [16, 64], strides = [1, 1]} : vector<16x128xf32> to vector<16x64xf32>
    %5 = vector.extract_strided_slice %3 {offsets = [0, 64], sizes = [16, 64], strides = [1, 1]} : vector<16x128xf32> to vector<16x64xf32>
    %6 = arith.negf %4 : vector<16x64xf32>
    %7 = math.exp %6 : vector<16x64xf32>
    %cst_4 = arith.constant 1.000000e+00 : f32
    %8 = vector.broadcast %cst_4 : f32 to vector<16x64xf32>
    %9 = arith.addf %8, %7 : vector<16x64xf32>
    %10 = arith.divf %8, %9 : vector<16x64xf32>
    %11 = arith.mulf %4, %10 : vector<16x64xf32>
    %12 = arith.mulf %11, %5 : vector<16x64xf32>
    %c0_5 = arith.constant 0 : index
    %c0_6 = arith.constant 0 : index
    %13 = vector.load %arg4[%c0_5, %c0_6] : memref<64x32xf32, #tpu.memory_space<vmem>>, vector<64x32xf32>
    %cst_7 = arith.constant dense<0.000000e+00> : vector<16x32xf32>
    %14 = tpu.matmul %12, %13, %cst_7 {dimension_numbers = #tpu.dot_dimension_numbers<[1], [0], [0], [1], [0, 0, 1, 1], [], []>} : vector<16x64xf32>, vector<64x32xf32>, vector<16x32xf32> -> vector<16x32xf32>
    %c0_i32 = arith.constant 0 : i32
    %15 = arith.cmpi eq, %arg1, %c0_i32 : i32
    %c0_i32_8 = arith.constant 0 : i32
    %16 = arith.cmpi eq, %arg1, %c0_i32_8 : i32
    %17 = arith.andi %15, %16 : i1
    %18 = arith.extui %17 : i1 to i32
    %c0_i32_9 = arith.constant 0 : i32
    %19 = arith.cmpi ne, %18, %c0_i32_9 : i32
    scf.if %19 {
      %c0_16 = arith.constant 0 : index
      %c0_17 = arith.constant 0 : index
      %33 = vector.load %arg5[%c0_16, %c0_17] : memref<16x32xf32, #tpu.memory_space<vmem>>, vector<16x32xf32>
      tpu.vector_store %arg5[%c0_16, %c0_17], %14 {strides = array<i32>} : memref<16x32xf32, #tpu.memory_space<vmem>>, vector<16x32xf32>,
    } else {
    }
    %true = arith.constant true
    %20 = arith.xori %16, %true : i1
    %21 = arith.andi %15, %20 : i1
    %22 = arith.extui %21 : i1 to i32
    %c0_i32_10 = arith.constant 0 : i32
    %23 = arith.cmpi ne, %22, %c0_i32_10 : i32
    scf.if %23 {
      %c0_16 = arith.constant 0 : index
      %c0_17 = arith.constant 0 : index
      %33 = vector.load %arg6[%c0_16, %c0_17] : memref<16x32xf32, #tpu.memory_space<vmem>>, vector<16x32xf32>
      tpu.vector_store %arg6[%c0_16, %c0_17], %14 {strides = array<i32>} : memref<16x32xf32, #tpu.memory_space<vmem>>, vector<16x32xf32>,
    } else {
    }
    %true_11 = arith.constant true
    %24 = arith.xori %15, %true_11 : i1
    %true_12 = arith.constant true
    %25 = arith.xori %16, %true_12 : i1
    %26 = arith.andi %24, %25 : i1
    %27 = arith.extui %26 : i1 to i32
    %c0_i32_13 = arith.constant 0 : i32
    %28 = arith.cmpi ne, %27, %c0_i32_13 : i32
    scf.if %28 {
      %c0_16 = arith.constant 0 : index
      %c0_17 = arith.constant 0 : index
      %33 = vector.load %arg6[%c0_16, %c0_17] : memref<16x32xf32, #tpu.memory_space<vmem>>, vector<16x32xf32>
      %34 = arith.addf %33, %14 : vector<16x32xf32>
      %c0_18 = arith.constant 0 : index
      %c0_19 = arith.constant 0 : index
      %35 = vector.load %arg6[%c0_18, %c0_19] : memref<16x32xf32, #tpu.memory_space<vmem>>, vector<16x32xf32>
      tpu.vector_store %arg6[%c0_18, %c0_19], %34 {strides = array<i32>} : memref<16x32xf32, #tpu.memory_space<vmem>>, vector<16x32xf32>,
    } else {
    }
    %true_14 = arith.constant true
    %29 = arith.xori %15, %true_14 : i1
    %30 = arith.andi %29, %16 : i1
    %31 = arith.extui %30 : i1 to i32
    %c0_i32_15 = arith.constant 0 : i32
    %32 = arith.cmpi ne, %31, %c0_i32_15 : i32
    scf.if %32 {
      %c0_16 = arith.constant 0 : index
      %c0_17 = arith.constant 0 : index
      %33 = vector.load %arg6[%c0_16, %c0_17] : memref<16x32xf32, #tpu.memory_space<vmem>>, vector<16x32xf32>
      %34 = arith.addf %33, %14 : vector<16x32xf32>
      %c0_18 = arith.constant 0 : index
      %c0_19 = arith.constant 0 : index
      %35 = vector.load %arg5[%c0_18, %c0_19] : memref<16x32xf32, #tpu.memory_space<vmem>>, vector<16x32xf32>
      tpu.vector_store %arg5[%c0_18, %c0_19], %34 {strides = array<i32>} : memref<16x32xf32, #tpu.memory_space<vmem>>, vector<16x32xf32>,
    } else {
    }
    return
  }
  func.func @transform_0(%arg0: i32, %arg1: i32) -> (i32, i32) {
    %c0_i32 = arith.constant 0 : i32
    %c0_i32_0 = arith.constant 0 : i32
    return %arg0, %c0_i32 : i32, i32
  }
  func.func @transform_1(%arg0: i32, %arg1: i32) -> (i32, i32, i32) {
    %c0_i32 = arith.constant 0 : i32
    %c0_i32_0 = arith.constant 0 : i32
    %c0_i32_1 = arith.constant 0 : i32
    return %arg1, %c0_i32, %c0_i32_0 : i32, i32, i32
  }
  func.func @transform_2(%arg0: i32, %arg1: i32) -> (i32, i32) {
    %c0_i32 = arith.constant 0 : i32
    %c0_i32_0 = arith.constant 0 : i32
    return %arg1, %c0_i32 : i32, i32
  }
  func.func @transform_3(%arg0: i32, %arg1: i32) -> (i32, i32) {
    %c0_i32 = arith.constant 0 : i32
    %c0_i32_0 = arith.constant 0 : i32
    return %arg0, %c0_i32 : i32, i32
  }
}

</mosaic_0001>

<bundles_post_ra>
// kernel: tpu_custom_call.1
= control target key start
LH: loop header
LB: loop body
LE: loop exit
PB: predicated region body
PF: predicated region fallthrough
CT: control target
= control target key end

     0   :  { %s316_s0 = inlined_call_operand.vmem [shape: f32[16,32], index: 0, kind: input, shape index: {}]   ;;  %s317_s1 = inlined_call_operand.vmem [shape: f32[1,32,128], index: 1, kind: input, shape index: {}]   ;;  %s318_s2 = inlined_call_operand.vmem [shape: f32[64,32], index: 2, kind: input, shape index: {}]   ;;  %s319_s3 = inlined_call_operand.hbm [shape: f32[16,32], index: 3, kind: output, shape index: {}]  }
   0x1   :  { %v20_v0 = vld [vmem:[%s317_s1 + $0x18] sm:$0xff]  ;;  %v19_v1 = vld [vmem:[%s317_s1 + $0x10] sm:$0xff]  ;;  %v18_v2 = vld [vmem:[%s317_s1 + $0x8] sm:$0xff] }
   0x2   :  { %40 = vmatpush.msra.mxu0 %v20_v0  ;;  %193 = vmatpush.msra.mxu3 %v20_v0 }
   0x3   :  { %8 = vsyncpa [#allocation4], 0  ;;  %v17_v3 = vld [vmem:[%s317_s1] sm:$0xff]  ;;  %vm21_vm0 = vcmask 261120   ;;  %v16_v5 = vld [vmem:[%s316_s0 + $0x8] sm:$0xff]  ;;  %vm109_vm8 = vcmask 523264  }
   0x4   :  { %41 = vmatpush.msra.mxu0 %v19_v1  ;;  %194 = vmatpush.msra.mxu3 %v19_v1  ;;  %v15_v4 = vld [vmem:[%s316_s0] sm:$0xff]  ;;  %v108_v6 = vld [vmem:[%s318_s2 + $0x38] sm:$0xff]  ;;  %v107_v7 = vld [vmem:[%s318_s2 + $0x30] sm:$0xff]  ;;  %s243_s0 = smov 64   ;;  %s175_s15 = sshll.u32 %s319_s3, 4  ;;  %s176_s15 = int_to_ptr.hbm [resolvable:$true] %s175_s15 }
   0x5   :  { %197 = vmatpush.msra.mxu2 %v108_v6  ;;  %124 = vmatpush.msra.mxu1 %v108_v6  ;;  %v106_v8 = vld [vmem:[%s318_s2 + $0x28] sm:$0xff]  ;;  %v105_v10 = vld [vmem:[%s318_s2 + $0x20] sm:$0xff]  ;;  %v104_v11 = vld [vmem:[%s318_s2 + $0x18] sm:$0xff]  ;;  %s245_s16 = smov 128   ;;  %s246_s17 = smov 8  }
   0x6   :  { %42 = vmatpush.msra.mxu0 %v18_v2  ;;  %195 = vmatpush.msra.mxu3 %v18_v2  ;;  %v103_v12 = vld [vmem:[%s318_s2 + $0x10] sm:$0xff]  ;;  %v102_v13 = vld [vmem:[%s318_s2 + $0x8] sm:$0xff]  ;;  %v101_v20 = vld [vmem:[%s318_s2] sm:$0xff]  ;;  %s244_s2 = smov [#allocation3]  }
   0x7   :  { %198 = vmatpush.msra.mxu2 %v107_v7  ;;  %125 = vmatpush.msra.mxu1 %v107_v7  ;;  %s173_s12 = sshll.u32 %s244_s2, 4  ;;  %s174_s12 = int_to_ptr.vmem [resolvable:$true] %s173_s12 }
   0x8   :  { %43 = vmatpush.msra.mxu0 %v17_v3  ;;  %196 = vmatpush.msra.mxu3 %v17_v3 }
   0x9   :  { %187 = vmatmul.msk.f32.vlgmr.msra.gmra.mxu0 %vm21_vm0, %v15_v4  ;;  %188 = vmatmul.msk.f32.vlgmr.msra.gmra.mxu3 %vm21_vm0, %v16_v5 }
   0xa   :  { %199 = vmatpush.msra.mxu2 %v106_v8  ;;  %126 = vmatpush.msra.mxu1 %v106_v8 }
   0xc   :  { %200 = vmatpush.msra.mxu2 %v105_v10  ;;  %127 = vmatpush.msra.mxu1 %v105_v10 }
   0xe   :  { %201 = vmatpush.msra.mxu2 %v104_v11  ;;  %128 = vmatpush.msra.mxu1 %v104_v11 }
  0x10   :  { %202 = vmatpush.msra.mxu2 %v103_v12  ;;  %129 = vmatpush.msra.mxu1 %v103_v12 }
  0x12   :  { %203 = vmatpush.msra.mxu2 %v102_v13  ;;  %130 = vmatpush.msra.mxu1 %v102_v13 }
  0x14   :  { %204 = vmatpush.msra.mxu2 %v101_v20  ;;  %131 = vmatpush.msra.mxu1 %v101_v20 }
  0x86   :  { %v45_v14 = vpop.f32.mrf.mxu0 }
  0x87   :  { %v189_v16 = vmul.f32 -1.442695, %v45_v14 }
  0x8c   :  { %v48_v9 = vpop.f32.mrf.mxu3 }
  0x8d   :  { %95 = vrot.lane.b32.xlu0 %v48_v9, %s243_s0  ;;  %v190_v15 = vmul.f32 -1.442695, %v48_v9 }
  0x8f   :  { %209 = vpow2.f32 %v190_v15 }
  0x90   :  { %211 = vpow2.f32 %v189_v16 }
  0x95   :  { %93 = vrot.lane.b32.xlu0 %v45_v14, %s243_s0  ;;  %v210_v17 = vpop.eup %209 }
  0x96   :  { %v58_v18 = vadd.f32 1.0, %v210_v17  ;;  %v212_v19 = vpop.eup %211 }
  0x97   :  { %v57_v21 = vadd.f32 1.0, %v212_v19 }
  0x98   :  { %213 = vrcp.f32 %v58_v18  ;;  %v85_v30 = vand.u32 2147483648, %v58_v18  ;;  %vm79_vm2 = vweird.f32 %v58_v18  ;;  %v83_v31 = vand.u32 2147483647, %v58_v18 }
  0x99   :  { %215 = vrcp.f32 %v57_v21  ;;  %vm64_vm4 = vweird.f32 %v57_v21  ;;  %v70_v35 = vand.u32 2147483648, %v57_v21  ;;  %v68_v38 = vand.u32 2147483647, %v57_v21 }
  0x9a   :  { %v86_v34 = vor.u32 1.1754944e-38, %v85_v30  ;;  %vm84_vm6 = vcmp.eq.f32.partialorder %v83_v31, 8.507059e+37 }
  0x9b   :  { %v71_v40 = vor.u32 1.1754944e-38, %v70_v35  ;;  %vm69_vm9 = vcmp.eq.f32.partialorder %v68_v38, 8.507059e+37 }
  0x9e   :  { %v214_v22 = vpop.eup %213 }
  0x9f   :  { %v75_v23 = vmul.f32 %v214_v22, %v58_v18  ;;  %v216_v25 = vpop.eup %215  ;;  %vm80_vm1 = vweird.f32 %v214_v22 }
  0xa0   :  { %v60_v26 = vmul.f32 %v216_v25, %v57_v21  ;;  %vm81_vm3 = vmor %vm79_vm2, %vm80_vm1  ;;  %vm65_vm5 = vweird.f32 %v216_v25 }
  0xa1   :  { %v76_v24 = vsub.f32 1.0, %v75_v23  ;;  %vm66_vm7 = vmor %vm64_vm4, %vm65_vm5 }
  0xa2   :  { %v61_v28 = vsub.f32 1.0, %v60_v26 }
  0xa3   :  { %v77_v27 = vmul.f32 %v214_v22, %v76_v24 }
  0xa4   :  { %v62_v32 = vmul.f32 %v216_v25, %v61_v28 }
  0xa5   :  { %v78_v29 = vadd.f32 %v214_v22, %v77_v27 }
  0xa6   :  { %v63_v37 = vadd.f32 %v216_v25, %v62_v32 }
  0xa7   :  { %v82_v33 = vsel %vm81_vm3, %v214_v22, %v78_v29 }
  0xa8   :  { %v87_v36 = vsel %vm84_vm6, %v86_v34, %v82_v33  ;;  %v67_v42 = vsel %vm66_vm7, %v216_v25, %v63_v37 }
  0xa9   :  { %v90_v39 = vmul.f32 %v87_v36, %v48_v9  ;;  %v72_v44 = vsel %vm69_vm9, %v71_v40, %v67_v42 }
  0xaa   :  { %v89_v45 = vmul.f32 %v72_v44, %v45_v14 }
  0xff   :  { %v96_v41 = vpop.permute.xlu0 %95 }
 0x100   :  { %v100_v43 = vmul.f32 %v96_v41, %v90_v39 }
 0x102   :  { %192 = vmatmul.msk.f32.vlgmr.msra.gmra.mxu2 %vm109_vm8, %v100_v43 }
 0x107   :  { %v94_v46 = vpop.permute.xlu0 %93 }
 0x108   :  { %v99_v47 = vmul.f32 %v94_v46, %v89_v45 }
 0x10a   :  { %191 = vmatmul.msk.f32.vlgmr.msra.gmra.mxu1 %vm109_vm8, %v99_v47 }
 0x185   :  { %v136_v48 = vpop.f32.mrf.mxu2 }
 0x186   :  { %144 = vst.msk [vmem:[#allocation3 + $0x8] sm:$0xff] %vm21_vm0, %v136_v48 }
 0x187   :  { %v133_v49 = vpop.f32.mrf.mxu1 }
 0x188   :  { %143 = vst.msk [vmem:[#allocation3] sm:$0xff] %vm21_vm0, %v133_v49 }
 0x189   :  { %181 = dma.vmem_to_hbm [thread:$0]  %s174_s12, 256, %s176_s15, [#allocation4], %s245_s16, %s245_s16, %s246_s17  }
 0x18a   :  { %241 = dma.done.wait [#allocation4], 256  }
 0x18b   :  { %242 = vsyncadd [#allocation4], 4294967040 }
 0x18c   :  { %186 = vsyncpa [#allocation4], 1 }

</bundles_post_ra>
